<compile_context>
chip_gen: v6e
topology: v6e:2x2x1
jax: 0.10.0
libtpu: 0.0.40
codegen_flags: <defaults>
</compile_context>

<pallas_src>
import functools

import jax
import jax.numpy as jnp
from jax.experimental import pallas as pl
from jax.experimental.pallas import tpu as pltpu

D_IN = 1024
D_HID = 256
D_OUT = 128
MAX_M_TILE = 512  # ~2 MiB f32 x-tile; double-buffered it is far below VMEM limits.


def _round_up(x, mult):
    return -(-x // mult) * mult


def _choose_m_tile(m: int) -> int:
    """Row tile: big enough to saturate the MXU, small enough that tiny
    batches still get >=2 grid steps (v7x megacore) with minimal padding."""
    if m <= 8:
        return 8
    per_core = -(-m // 2)                    # ceil(m / 2): aim for >= 2 grid steps
    return min(MAX_M_TILE, _round_up(per_core, 8))


def _mlp_kernel(x_ref, w1_ref, b1_ref, w2_ref, b2_ref, o_ref):
    # Layer 1: (tm, 1024)bf16 @ (1024, 256)bf16 -> f32 acc, +bias (VPU), tanh (EUP).
    x16 = x_ref[...].astype(jnp.bfloat16)
    h = jnp.dot(x16, w1_ref[...], preferred_element_type=jnp.float32)
    h = jnp.tanh(h + b1_ref[...])
    # Layer 2: (tm, 256)bf16 @ (256, 128)bf16 -> f32 acc, +bias.
    y = jnp.dot(h.astype(jnp.bfloat16), w2_ref[...],
                preferred_element_type=jnp.float32) + b2_ref[...]
    o_ref[...] = y.astype(o_ref.dtype)


@functools.partial(jax.jit, static_argnames=("m_tile",))
def _tucker_mlp(x, w1_t, b1, w2_t, b2, *, m_tile):
    """x: (M, 1024) f32 with M a multiple of m_tile. Returns (M, 128) f32."""
    m = x.shape[0]
    grid = (m // m_tile,)
    # Feed bf16 weights to the MXU (tiny one-off cast); biases stay f32.
    w1_bf = w1_t.astype(jnp.bfloat16)
    w2_bf = w2_t.astype(jnp.bfloat16)

    cost = pl.CostEstimate(
        flops=2 * m * (D_IN * D_HID + D_HID * D_OUT),
        transcendentals=m * D_HID,
        bytes_accessed=(m * D_IN * 4 + m * D_OUT * 4
                        + (D_IN * D_HID + D_HID * D_OUT) * 2
                        + (D_HID + D_OUT) * 4),
    )

    return pl.pallas_call(
        _mlp_kernel,
        out_shape=jax.ShapeDtypeStruct((m, D_OUT), jnp.float32),
        grid_spec=pltpu.PrefetchScalarGridSpec(
            num_scalar_prefetch=0,
            grid=grid,
            in_specs=[
                pl.BlockSpec((m_tile, D_IN), lambda i: (i, 0)),
                # Weights / biases: constant block index -> stay resident in VMEM.
                pl.BlockSpec((D_IN, D_HID), lambda i: (0, 0)),
                pl.BlockSpec((1, D_HID), lambda i: (0, 0)),
                pl.BlockSpec((D_HID, D_OUT), lambda i: (0, 0)),
                pl.BlockSpec((1, D_OUT), lambda i: (0, 0)),
            ],
            out_specs=pl.BlockSpec((m_tile, D_OUT), lambda i: (i, 0)),
        ),
        compiler_params=pltpu.CompilerParams(
            dimension_semantics=("parallel",),
        ),
        cost_estimate=cost,
    )(x, w1_bf, b1, w2_bf, b2)


def tucker_fnn_forward(X, params):
    """X: (B, 3, 1024) f32 -> (anchor, pos, neg), each (B, 128) f32."""
    w1_t, b1, w2_t, b2 = params
    B = X.shape[0]
    m = 3 * B
    # Free reshape of the already-contiguous array; rows interleave as
    # (a0, p0, n0, a1, ...) and are un-interleaved identically on the way out.
    rows = X.reshape(m, D_IN)
    m_tile = _choose_m_tile(m)
    pad = (-m) % m_tile
    if pad:
        rows = jnp.pad(rows, ((0, pad), (0, 0)))
    out = _tucker_mlp(rows, w1_t, b1, w2_t, b2, m_tile=m_tile)[:m]
    out = out.reshape(B, 3, D_OUT)
    return out[:, 0, :], out[:, 1, :], out[:, 2, :]


def init_params(key):
    """Deterministic init matching the PyTorch module's parameter shapes."""
    k1, k2, k3, k4 = jax.random.split(key, 4)
    # torch Linear default init: U(-1/sqrt(fan_in), 1/sqrt(fan_in))
    lim1 = 1.0 / jnp.sqrt(jnp.float32(D_IN))
    lim2 = 1.0 / jnp.sqrt(jnp.float32(D_HID))
    w1 = jax.random.uniform(k1, (D_HID, D_IN), jnp.float32, -lim1, lim1)
    b1 = jax.random.uniform(k2, (D_HID,), jnp.float32, -lim1, lim1)
    w2 = jax.random.uniform(k3, (D_OUT, D_HID), jnp.float32, -lim2, lim2)
    b2 = jax.random.uniform(k4, (D_OUT,), jnp.float32, -lim2, lim2)
    # Store transposed weights / row-broadcast biases for the kernel layout.
    return (w1.T, b1.reshape(1, D_HID), w2.T, b2.reshape(1, D_OUT))


if __name__ == "__main__":
    key = jax.random.PRNGKey(0)
    kx, kp = jax.random.split(key)
    B = 4
    X = jax.random.normal(kx, (B, 3, D_IN), jnp.float32)
    params = init_params(kp)

    anchor, pos, neg = tucker_fnn_forward(X, params)
    jax.block_until_ready((anchor, pos, neg))

    # References.
    w1_t, b1, w2_t, b2 = params

    def ref_f32(x):
        return jnp.tanh(x @ w1_t + b1) @ w2_t + b2

    def ref_bf16(x):  # same bf16-in / f32-accumulate path as the kernel
        h = jnp.dot(x.astype(jnp.bfloat16), w1_t.astype(jnp.bfloat16),
                    preferred_element_type=jnp.float32)
        h = jnp.tanh(h + b1)
        return jnp.dot(h.astype(jnp.bfloat16), w2_t.astype(jnp.bfloat16),
                       preferred_element_type=jnp.float32) + b2

    assert anchor.shape == (B, D_OUT) and pos.shape == (B, D_OUT) and neg.shape == (B, D_OUT)
    for slot, y in enumerate((anchor, pos, neg)):
        x_s = X[:, slot, :]
        # Tight check against the bf16-matched reference.
        assert jnp.allclose(y, ref_bf16(x_s), atol=5e-3, rtol=5e-3)
        # Loose sanity check against the full-f32 PyTorch-equivalent math.
        assert jnp.allclose(y, ref_f32(x_s), atol=6e-2, rtol=6e-2)

    print("KERNEL_OK")
</pallas_src>

<mosaic_0001>
module attributes {stable_mosaic.version = 11 : i64} {
  func.func @_mlp_kernel(%arg0: i32, %arg1: memref<8x1024xf32, #tpu.memory_space<vmem>>, %arg2: memref<1024x256xbf16, #tpu.memory_space<vmem>>, %arg3: memref<1x256xf32, #tpu.memory_space<vmem>>, %arg4: memref<256x128xbf16, #tpu.memory_space<vmem>>, %arg5: memref<1x128xf32, #tpu.memory_space<vmem>>, %arg6: memref<8x128xf32, #tpu.memory_space<vmem>>) attributes {dimension_semantics = [#tpu.dimension_semantics<parallel>], iteration_bounds = array<i64: 2>, scalar_prefetch = 0 : i64, scratch_operands = 0 : i64, tpu.core_type = #tpu.core_type<tc>, window_params = [{transform_indices = @transform_0, window_bounds = array<i64: 8, 1024>}, {pipeline_mode = #tpu.pipeline_mode<synchronous>, transform_indices = @transform_1, window_bounds = array<i64: 1024, 256>}, {pipeline_mode = #tpu.pipeline_mode<synchronous>, transform_indices = @transform_2, window_bounds = array<i64: 1, 256>}, {pipeline_mode = #tpu.pipeline_mode<synchronous>, transform_indices = @transform_3, window_bounds = array<i64: 256, 128>}, {pipeline_mode = #tpu.pipeline_mode<synchronous>, transform_indices = @transform_4, window_bounds = array<i64: 1, 128>}, {transform_indices = @transform_5, window_bounds = array<i64: 8, 128>}]} {
    %c0 = arith.constant 0 : index
    %c0_0 = arith.constant 0 : index
    %0 = vector.load %arg1[%c0, %c0_0] : memref<8x1024xf32, #tpu.memory_space<vmem>>, vector<8x1024xf32>
    %1 = arith.truncf %0 : vector<8x1024xf32> to vector<8x1024xbf16>
    %c0_1 = arith.constant 0 : index
    %c0_2 = arith.constant 0 : index
    %2 = vector.load %arg2[%c0_1, %c0_2] : memref<1024x256xbf16, #tpu.memory_space<vmem>>, vector<1024x256xbf16>
    %cst = arith.constant dense<0.000000e+00> : vector<8x256xf32>
    %3 = tpu.matmul %1, %2, %cst {dimension_numbers = #tpu.dot_dimension_numbers<[1], [0], [0], [1], [0, 0, 1, 1], [], []>} : vector<8x1024xbf16>, vector<1024x256xbf16>, vector<8x256xf32> -> vector<8x256xf32>
    %c0_3 = arith.constant 0 : index
    %c0_4 = arith.constant 0 : index
    %4 = vector.load %arg3[%c0_3, %c0_4] : memref<1x256xf32, #tpu.memory_space<vmem>>, vector<1x256xf32>
    %5 = vector.broadcast %4 : vector<1x256xf32> to vector<8x256xf32>
    %6 = arith.addf %3, %5 : vector<8x256xf32>
    %7 = math.tanh %6 : vector<8x256xf32>
    %8 = arith.truncf %7 : vector<8x256xf32> to vector<8x256xbf16>
    %c0_5 = arith.constant 0 : index
    %c0_6 = arith.constant 0 : index
    %9 = vector.load %arg4[%c0_5, %c0_6] : memref<256x128xbf16, #tpu.memory_space<vmem>>, vector<256x128xbf16>
    %cst_7 = arith.constant dense<0.000000e+00> : vector<8x128xf32>
    %10 = tpu.matmul %8, %9, %cst_7 {dimension_numbers = #tpu.dot_dimension_numbers<[1], [0], [0], [1], [0, 0, 1, 1], [], []>} : vector<8x256xbf16>, vector<256x128xbf16>, vector<8x128xf32> -> vector<8x128xf32>
    %c0_8 = arith.constant 0 : index
    %c0_9 = arith.constant 0 : index
    %11 = vector.load %arg5[%c0_8, %c0_9] : memref<1x128xf32, #tpu.memory_space<vmem>>, vector<1x128xf32>
    %12 = vector.broadcast %11 : vector<1x128xf32> to vector<8x128xf32>
    %13 = arith.addf %10, %12 : vector<8x128xf32>
    %c0_10 = arith.constant 0 : index
    %c0_11 = arith.constant 0 : index
    %14 = vector.load %arg6[%c0_10, %c0_11] : memref<8x128xf32, #tpu.memory_space<vmem>>, vector<8x128xf32>
    tpu.vector_store %arg6[%c0_10, %c0_11], %13 {strides = array<i32>} : memref<8x128xf32, #tpu.memory_space<vmem>>, vector<8x128xf32>,
    return
  }
  func.func @transform_0(%arg0: i32) -> (i32, i32) {
    %c0_i32 = arith.constant 0 : i32
    %c0_i32_0 = arith.constant 0 : i32
    return %arg0, %c0_i32 : i32, i32
  }
  func.func @transform_1(%arg0: i32) -> (i32, i32) {
    %c0_i32 = arith.constant 0 : i32
    %c0_i32_0 = arith.constant 0 : i32
    %c0_i32_1 = arith.constant 0 : i32
    return %c0_i32, %c0_i32_0 : i32, i32
  }
  func.func @transform_2(%arg0: i32) -> (i32, i32) {
    %c0_i32 = arith.constant 0 : i32
    %c0_i32_0 = arith.constant 0 : i32
    %c0_i32_1 = arith.constant 0 : i32
    return %c0_i32, %c0_i32_0 : i32, i32
  }
  func.func @transform_3(%arg0: i32) -> (i32, i32) {
    %c0_i32 = arith.constant 0 : i32
    %c0_i32_0 = arith.constant 0 : i32
    %c0_i32_1 = arith.constant 0 : i32
    return %c0_i32, %c0_i32_0 : i32, i32
  }
  func.func @transform_4(%arg0: i32) -> (i32, i32) {
    %c0_i32 = arith.constant 0 : i32
    %c0_i32_0 = arith.constant 0 : i32
    %c0_i32_1 = arith.constant 0 : i32
    return %c0_i32, %c0_i32_0 : i32, i32
  }
  func.func @transform_5(%arg0: i32) -> (i32, i32) {
    %c0_i32 = arith.constant 0 : i32
    %c0_i32_0 = arith.constant 0 : i32
    return %arg0, %c0_i32 : i32, i32
  }
}

</mosaic_0001>

<bundles_post_ra>
// kernel: _tucker_mlp.1
= control target key start
LH: loop header
LB: loop body
LE: loop exit
PB: predicated region body
PF: predicated region fallthrough
CT: control target
= control target key end

     0   :  { %10 = vsyncpa [#allocation3], 0  ;;  %s2501_s0 = inlined_call_operand.vmem [shape: f32[16,1024], index: 0, kind: input, shape index: {}]   ;;  %s2502_s1 = inlined_call_operand.vmem [shape: bf16[1024,256], index: 1, kind: input, shape index: {}]   ;;  %s2503_s2 = inlined_call_operand.vmem [shape: f32[1,256], index: 2, kind: input, shape index: {}]   ;;  %s2504_s3 = inlined_call_operand.vmem [shape: bf16[256,128], index: 3, kind: input, shape index: {}]   ;;  %s2505_s4 = inlined_call_operand.vmem [shape: f32[1,128], index: 4, kind: input, shape index: {}]   ;;  %s2506_s5 = inlined_call_operand.hbm [shape: f32[16,128], index: 5, kind: output, shape index: {}]  }
   0x1   :  { %12 = vsyncpa [#allocation3 + $0x1], 0  ;;  %s1960_s18 = smov 0   ;;  %s1962_s19 = smov 0  }
   0x2   :  { %s1964_s20 = smov 0   ;;  %s1966_s21 = smov 0  }
   0x3 LB: > { %s1981_s22 = sadd.s32 4294967295, %s1927_s21   ;;  %s1437_s23 = sadd.s32 4294967294, %s1927_s21   ;;  %s1927_s21 = sphi %s1966_s21, %s2512_s21   ;;  %s1923_s20 = sphi %s1964_s20, %s2511_s20   ;;  %s1919_s19 = sphi %s1962_s19, %s2510_s19   ;;  %s1915_s18 = sphi %s1960_s18, %s2509_s18  }
   0x4   : > { %s1985_s24 = sadd.s32 1, %s1927_s21   ;;  %s135_s25 = sadd.s32 1, %s1923_s20 }
   0x5   : > { %s132_s26 = ssub.s32 %s1927_s21, %s1985_s24  ;;  %p145_p0 = scmp.ne.s32.totalorder %s1923_s20, %s1919_s19 }
   0x6   : > { %p133_p1 = scmp.eq.s32.totalorder %s132_s26, 0  ;;  %p146_p2 = scmp.eq.s32.totalorder %s1981_s22, 1 }
   0x7   : > { %p151_p3 = scmp.ne.s32.totalorder %s1919_s19, %s1915_s18  ;;  %p152_p4 = scmp.eq.s32.totalorder %s1437_s23, 1 }
   0x8   : > { %s1996_s27 = scalar_select %p133_p1, %s1923_s20, %s135_s25  }
   0x9   : > { %p1998_p5 = por %p146_p2, %p145_p0  ;;  %p2002_p6 = por %p152_p4, %p151_p3 }
   0xa   : > { %p1440_p7 = scmp.ge.s32.totalorder %s1927_s21, 1  ;;  %p190_p8 = scmp.lt.s32.totalorder %s1927_s21, 3 }
   0xc   : > { %p191_p9 = pnand %p1440_p7, %p190_p8 }
   0xd   : > { %p218_p10 = scmp.lt.s32.totalorder (!%p191_p9), %s1981_s22, 1  ;;  %s215_s7 = sand.u32 (!%p191_p9), 1, %s1919_s19  }
   0xe   : > { %194 = sbr.rel (%p191_p9) target bundleno = 576 (0x240), region = 40  ;;  %s1365_s17 = scalar_lea.sflag (!%p191_p9), [#allocation3], %s215_s7 }
  0x13   : > { %v1655_v0 = vld [vmem:[%s2502_s1 + $0x74] ss:$8 sps:$4 sm:$0xff]   ;;  %v1659_v2 = vld [vmem:[%s2502_s1 + $0x70] ss:$8 sps:$4 sm:$0xff]   ;;  %v1661_v4 = vld [vmem:[%s2502_s1 + $0x64] ss:$8 sps:$4 sm:$0xff]  }
  0x14   : > { %v1657_v1 = vld [vmem:[%s2502_s1 + $0x174] ss:$8 sps:$4 sm:$0xff]   ;;  %1020 = vmatprep.subr.bf16.mxu0 %v1655_v0  ;;  %v1660_v3 = vld [vmem:[%s2502_s1 + $0x170] ss:$8 sps:$4 sm:$0xff]   ;;  %v1663_v5 = vld [vmem:[%s2502_s1 + $0x164] ss:$8 sps:$4 sm:$0xff]  }
  0x15   : > { %1061 = vmatprep.subr.bf16.mxu1 %v1657_v1  ;;  %1021 = vmatpush1.bf16.msra.mxu0 %v1659_v2  ;;  %v1665_v6 = vld [vmem:[%s2502_s1 + $0x60] ss:$8 sps:$4 sm:$0xff]   ;;  %v1667_v8 = vld [vmem:[%s2502_s1 + $0x54] ss:$8 sps:$4 sm:$0xff]   ;;  %v1671_v10 = vld [vmem:[%s2502_s1 + $0x50] ss:$8 sps:$4 sm:$0xff]  }
  0x16   : > { %1062 = vmatpush1.bf16.msra.mxu1 %v1660_v3  ;;  %1022 = vmatprep.subr.bf16.mxu0 %v1661_v4  ;;  %v1666_v7 = vld [vmem:[%s2502_s1 + $0x160] ss:$8 sps:$4 sm:$0xff]   ;;  %v1669_v9 = vld [vmem:[%s2502_s1 + $0x154] ss:$8 sps:$4 sm:$0xff]   ;;  %v1672_v11 = vld [vmem:[%s2502_s1 + $0x150] ss:$8 sps:$4 sm:$0xff]  }
  0x17   : > { %1063 = vmatprep.subr.bf16.mxu1 %v1663_v5  ;;  %v1673_v12 = vld [vmem:[%s2502_s1 + $0x44] ss:$8 sps:$4 sm:$0xff]   ;;  %v1677_v14 = vld [vmem:[%s2502_s1 + $0x40] ss:$8 sps:$4 sm:$0xff]   ;;  %v1679_v16 = vld [vmem:[%s2502_s1 + $0x34] ss:$8 sps:$4 sm:$0xff]  }
  0x18   : > { %v1675_v13 = vld [vmem:[%s2502_s1 + $0x144] ss:$8 sps:$4 sm:$0xff]   ;;  %v1678_v15 = vld [vmem:[%s2502_s1 + $0x140] ss:$8 sps:$4 sm:$0xff]   ;;  %v1681_v17 = vld [vmem:[%s2502_s1 + $0x134] ss:$8 sps:$4 sm:$0xff]  }
  0x19   : > { %1023 = vmatpush1.bf16.msra.mxu0 %v1665_v6  ;;  %v1683_v18 = vld [vmem:[%s2502_s1 + $0x30] ss:$8 sps:$4 sm:$0xff]   ;;  %v1685_v20 = vld [vmem:[%s2502_s1 + $0x24] ss:$8 sps:$4 sm:$0xff]   ;;  %v1689_v22 = vld [vmem:[%s2502_s1 + $0x20] ss:$8 sps:$4 sm:$0xff]  }
  0x1a   : > { %1064 = vmatpush1.bf16.msra.mxu1 %v1666_v7  ;;  %1024 = vmatprep.subr.bf16.mxu0 %v1667_v8  ;;  %v1684_v19 = vld [vmem:[%s2502_s1 + $0x130] ss:$8 sps:$4 sm:$0xff]   ;;  %v1687_v21 = vld [vmem:[%s2502_s1 + $0x124] ss:$8 sps:$4 sm:$0xff]   ;;  %v1690_v23 = vld [vmem:[%s2502_s1 + $0x120] ss:$8 sps:$4 sm:$0xff]  }
  0x1b   : > { %1065 = vmatprep.subr.bf16.mxu1 %v1669_v9  ;;  %v1691_v24 = vld [vmem:[%s2502_s1 + $0x14] ss:$8 sps:$4 sm:$0xff]   ;;  %v1695_v26 = vld [vmem:[%s2502_s1 + $0x10] ss:$8 sps:$4 sm:$0xff]   ;;  %v1697_v28 = vld [vmem:[%s2502_s1 + $0x4] ss:$8 sps:$4 sm:$0xff]  }
  0x1c   : > { %v1693_v25 = vld [vmem:[%s2502_s1 + $0x114] ss:$8 sps:$4 sm:$0xff]   ;;  %v1696_v27 = vld [vmem:[%s2502_s1 + $0x110] ss:$8 sps:$4 sm:$0xff]   ;;  %v1699_v29 = vld [vmem:[%s2502_s1 + $0x104] ss:$8 sps:$4 sm:$0xff]  }
  0x1d   : > { %1025 = vmatpush1.bf16.msra.mxu0 %v1671_v10  ;;  %v1701_v30 = vld [vmem:[%s2502_s1] ss:$8 sps:$4 sm:$0xff]   ;;  %v1703_v32 = vld [vmem:[%s2502_s1 + $0xf4] ss:$8 sps:$4 sm:$0xff]   ;;  %v1707_v34 = vld [vmem:[%s2502_s1 + $0xf0] ss:$8 sps:$4 sm:$0xff]  }
  0x1e   : > { %1066 = vmatpush1.bf16.msra.mxu1 %v1672_v11  ;;  %1026 = vmatprep.subr.bf16.mxu0 %v1673_v12  ;;  %v1702_v31 = vld [vmem:[%s2502_s1 + $0x100] ss:$8 sps:$4 sm:$0xff]   ;;  %v1705_v33 = vld [vmem:[%s2502_s1 + $0x1f4] ss:$8 sps:$4 sm:$0xff]   ;;  %v1708_v35 = vld [vmem:[%s2502_s1 + $0x1f0] ss:$8 sps:$4 sm:$0xff]  }
  0x1f   : > { %1067 = vmatprep.subr.bf16.mxu1 %v1675_v13  ;;  %v1709_v36 = vld [vmem:[%s2502_s1 + $0xe4] ss:$8 sps:$4 sm:$0xff]   ;;  %s219_s15 = scalar_select %p218_p10, %s1981_s22, 1  ;;  %v1713_v38 = vld [vmem:[%s2502_s1 + $0xe0] ss:$8 sps:$4 sm:$0xff]  }
  0x20   : > { %v1711_v37 = vld [vmem:[%s2502_s1 + $0x1e4] ss:$8 sps:$4 sm:$0xff]   ;;  %v1714_v39 = vld [vmem:[%s2502_s1 + $0x1e0] ss:$8 sps:$4 sm:$0xff]   ;;  %v1715_v40 = vld [vmem:[%s2502_s1 + $0xd4] ss:$8 sps:$4 sm:$0xff]  }
  0x21   : > { %1027 = vmatpush1.bf16.msra.mxu0 %v1677_v14  ;;  %s1593_s8 = sshll.u32 %s219_s15, 6  ;;  %v1717_v41 = vld [vmem:[%s2502_s1 + $0x1d4] ss:$8 sps:$4 sm:$0xff]   ;;  %v1719_v42 = vld [vmem:[%s2502_s1 + $0xd0] ss:$8 sps:$4 sm:$0xff]  }
  0x22   : > { %1068 = vmatpush1.bf16.msra.mxu1 %v1678_v15  ;;  %1028 = vmatprep.subr.bf16.mxu0 %v1679_v16  ;;  %v1720_v43 = vld [vmem:[%s2502_s1 + $0x1d0] ss:$8 sps:$4 sm:$0xff]   ;;  %s2145_s23 = scalar_lea.vmem %s2501_s0, %s1593_s8  ;;  %v1721_v44 = vld [vmem:[%s2502_s1 + $0xc4] ss:$8 sps:$4 sm:$0xff]   ;;  %v1725_v47 = vld [vmem:[%s2502_s1 + $0xc0] ss:$8 sps:$4 sm:$0xff]  }
  0x23   : > { %1069 = vmatprep.subr.bf16.mxu1 %v1681_v17  ;;  %v1723_v45 = vld [vmem:[%s2502_s1 + $0x1c4] ss:$8 sps:$4 sm:$0xff]   ;;  %v1726_v48 = vld [vmem:[%s2502_s1 + $0x1c0] ss:$8 sps:$4 sm:$0xff]   ;;  %v227_v50 = vld [vmem:[%s2145_s23 + $0x18] sm:$0xff]  ;;  %s1441_s8 = sshll.u32 %s215_s7, 3 }
  0x24   : > { %v225_v46 = vld [vmem:[%s2145_s23 + $0x8] sm:$0xff]  ;;  %v1727_v51 = vld [vmem:[%s2502_s1 + $0xb4] ss:$8 sps:$4 sm:$0xff]   ;;  %v235_v52 = vpack.c.bf16 %v227_v50, %v227_v50  ;;  %v1731_v54 = vld [vmem:[%s2502_s1 + $0xb0] ss:$8 sps:$4 sm:$0xff]   ;;  %s217_s11 = scalar_lea.vmem [#allocation2], %s1441_s8 }
  0x25   : > { %1029 = vmatpush1.bf16.msra.mxu0 %v1683_v18  ;;  %v233_v49 = vpack.c.bf16 %v225_v46, %v225_v46  ;;  %v1729_v53 = vld [vmem:[%s2502_s1 + $0x1b4] ss:$8 sps:$4 sm:$0xff]   ;;  %v1732_v55 = vld [vmem:[%s2502_s1 + $0x1b0] ss:$8 sps:$4 sm:$0xff]   ;;  %v1733_v56 = vld [vmem:[%s2502_s1 + $0xa4] ss:$8 sps:$4 sm:$0xff]  }
  0x26   : > { %1070 = vmatpush1.bf16.msra.mxu1 %v1684_v19  ;;  %1030 = vmatprep.subr.bf16.mxu0 %v1685_v20  ;;  %v1735_v57 = vld [vmem:[%s2502_s1 + $0x1a4] ss:$8 sps:$4 sm:$0xff]   ;;  %v1737_v58 = vld [vmem:[%s2502_s1 + $0xa0] ss:$8 sps:$4 sm:$0xff]   ;;  %v1739_v60 = vld [vmem:[%s2502_s1 + $0x94] ss:$8 sps:$4 sm:$0xff]  }
  0x27   : > { %1071 = vmatprep.subr.bf16.mxu1 %v1687_v21  ;;  %1052 = vmatprep.mubr.bf16.mxu0 %v233_v49  ;;  %v1738_v59 = vld [vmem:[%s2502_s1 + $0x1a0] ss:$8 sps:$4 sm:$0xff]   ;;  %v1741_v61 = vld [vmem:[%s2502_s1 + $0x194] ss:$8 sps:$4 sm:$0xff]   ;;  %v1743_v62 = vld [vmem:[%s2502_s1 + $0x90] ss:$8 sps:$4 sm:$0xff]  }
  0x28   : > { %1093 = vmatprep.mubr.bf16.mxu1 %v235_v52  ;;  %v1744_v63 = vld [vmem:[%s2502_s1 + $0x190] ss:$8 sps:$4 sm:$0xff]   ;;  %v1745_v0 = vld [vmem:[%s2502_s1 + $0x84] ss:$8 sps:$4 sm:$0xff]   ;;  %v1749_v2 = vld [vmem:[%s2502_s1 + $0x80] ss:$8 sps:$4 sm:$0xff]  }
  0x29   : > { %1031 = vmatpush1.bf16.msra.mxu0 %v1689_v22  ;;  %v1747_v1 = vld [vmem:[%s2502_s1 + $0x184] ss:$8 sps:$4 sm:$0xff]   ;;  %v1750_v3 = vld [vmem:[%s2502_s1 + $0x180] ss:$8 sps:$4 sm:$0xff]   ;;  %v226_v5 = vld [vmem:[%s2145_s23 + $0x10] sm:$0xff]  ;;  %s1378_s12 = sshll.u32 %s217_s11, 4  ;;  %s1379_s12 = int_to_ptr.vmem [resolvable:$true] %s1378_s12 }
  0x2a   : > { %1072 = vmatpush1.bf16.msra.mxu1 %v1690_v23  ;;  %1032 = vmatprep.subr.bf16.mxu0 %v1691_v24  ;;  %v224_v4 = vld [vmem:[%s2145_s23] sm:$0xff]  ;;  %v1753_v6 = vld [vmem:[%s2502_s1 + $0x274] ss:$8 sps:$4 sm:$0xff]   ;;  %v234_v9 = vpack.c.bf16 %v226_v5, %v226_v5  ;;  %v1751_v10 = vld [vmem:[%s2502_s1 + $0x270] ss:$8 sps:$4 sm:$0xff]   ;;  %s1867_s15 = scalar_lea.vmem %s1379_s12, 128 }
  0x2b   : > { %1073 = vmatprep.subr.bf16.mxu1 %v1693_v25  ;;  %v1756_v7 = vld [vmem:[%s2502_s1 + $0x374] ss:$8 sps:$4 sm:$0xff]   ;;  %v232_v8 = vpack.c.bf16 %v224_v4, %v224_v4  ;;  %v1754_v11 = vld [vmem:[%s2502_s1 + $0x370] ss:$8 sps:$4 sm:$0xff]   ;;  %v1759_v12 = vld [vmem:[%s2502_s1 + $0x264] ss:$8 sps:$4 sm:$0xff]   ;;  %p1868_p11 = scmp.ne.s32.totalorder %s1379_s12, %s1867_s15 }
  0x2c   : > { %v1762_v13 = vld [vmem:[%s2502_s1 + $0x364] ss:$8 sps:$4 sm:$0xff]   ;;  %v1757_v14 = vld [vmem:[%s2502_s1 + $0x260] ss:$8 sps:$4 sm:$0xff]   ;;  %v1765_v16 = vld [vmem:[%s2502_s1 + $0x254] ss:$8 sps:$4 sm:$0xff]  }
  0x2d   : > { %1033 = vmatpush1.bf16.msra.mxu0 %v1695_v26  ;;  %v1760_v15 = vld [vmem:[%s2502_s1 + $0x360] ss:$8 sps:$4 sm:$0xff]   ;;  %v1768_v17 = vld [vmem:[%s2502_s1 + $0x354] ss:$8 sps:$4 sm:$0xff]   ;;  %v1763_v18 = vld [vmem:[%s2502_s1 + $0x250] ss:$8 sps:$4 sm:$0xff]   ;;  %p1869_p12 = pnand %p1868_p11, %p1998_p5 }
  0x2e   : > { %1074 = vmatpush1.bf16.msra.mxu1 %v1696_v27  ;;  %1034 = vmatprep.subr.bf16.mxu0 %v1697_v28  ;;  %v1766_v19 = vld [vmem:[%s2502_s1 + $0x350] ss:$8 sps:$4 sm:$0xff]   ;;  %v1771_v20 = vld [vmem:[%s2502_s1 + $0x244] ss:$8 sps:$4 sm:$0xff]   ;;  %v1769_v22 = vld [vmem:[%s2502_s1 + $0x240] ss:$8 sps:$4 sm:$0xff]  }
  0x2f   : > { %1075 = vmatprep.subr.bf16.mxu1 %v1699_v29  ;;  %v1774_v21 = vld [vmem:[%s2502_s1 + $0x344] ss:$8 sps:$4 sm:$0xff]   ;;  %v1772_v23 = vld [vmem:[%s2502_s1 + $0x340] ss:$8 sps:$4 sm:$0xff]   ;;  %v1777_v24 = vld [vmem:[%s2502_s1 + $0x234] ss:$8 sps:$4 sm:$0xff]   ;;  %p1870_p13 = pneg %p1869_p12 }
  0x30   : > { %v1780_v25 = vld [vmem:[%s2502_s1 + $0x334] ss:$8 sps:$4 sm:$0xff]   ;;  %v1775_v26 = vld [vmem:[%s2502_s1 + $0x230] ss:$8 sps:$4 sm:$0xff]   ;;  %v1783_v28 = vld [vmem:[%s2502_s1 + $0x224] ss:$8 sps:$4 sm:$0xff]  }
  0x31   : > { %1035 = vmatpush1.bf16.msra.mxu0 %v1701_v30  ;;  %v1778_v27 = vld [vmem:[%s2502_s1 + $0x330] ss:$8 sps:$4 sm:$0xff]   ;;  %v1786_v29 = vld [vmem:[%s2502_s1 + $0x324] ss:$8 sps:$4 sm:$0xff]   ;;  %v1781_v30 = vld [vmem:[%s2502_s1 + $0x220] ss:$8 sps:$4 sm:$0xff]  }
  0x32   : > { %1076 = vmatpush1.bf16.msra.mxu1 %v1702_v31  ;;  %1036 = vmatprep.subr.bf16.mxu0 %v1703_v32  ;;  %v1784_v31 = vld [vmem:[%s2502_s1 + $0x320] ss:$8 sps:$4 sm:$0xff]   ;;  %v1789_v32 = vld [vmem:[%s2502_s1 + $0x214] ss:$8 sps:$4 sm:$0xff]   ;;  %v1799_v46 = vld [vmem:[%s2502_s1 + $0x2f0] ss:$8 sps:$4 sm:$0xff]  }
  0x33   : > { %1077 = vmatprep.subr.bf16.mxu1 %v1705_v33  ;;  %v1792_v33 = vld [vmem:[%s2502_s1 + $0x314] ss:$8 sps:$4 sm:$0xff]   ;;  %v1810_v49 = vld [vmem:[%s2502_s1 + $0x3e4] ss:$8 sps:$4 sm:$0xff]   ;;  %v1805_v50 = vld [vmem:[%s2502_s1 + $0x2e0] ss:$8 sps:$4 sm:$0xff]  }
  0x34   : > { %v1813_v52 = vld [vmem:[%s2502_s1 + $0x2d4] ss:$8 sps:$4 sm:$0xff]  }
  0x35   : > { %1037 = vmatpush2.bf16.msra.mxu0 %v1707_v34  ;;  %v1787_v34 = vld [vmem:[%s2502_s1 + $0x210] ss:$8 sps:$4 sm:$0xff]   ;;  %v1837_v4 = vld [vmem:[%s2502_s1 + $0x294] ss:$8 sps:$4 sm:$0xff]  }
  0x36   : > { %1078 = vmatpush2.bf16.msra.mxu1 %v1708_v35  ;;  %1038 = vmatprep.subr.bf16.mxu0 %v1709_v36  ;;  %v229_v35 = vld [vmem:[%s2145_s23 + $0x28] sm:$0xff]  ;;  %v1790_v36 = vld [vmem:[%s2502_s1 + $0x310] ss:$8 sps:$4 sm:$0xff]   ;;  %v1840_v5 = vld [vmem:[%s2502_s1 + $0x394] ss:$8 sps:$4 sm:$0xff]  }
  0x37   : > { %1079 = vmatprep.subr.bf16.mxu1 %v1711_v37  ;;  %v1795_v37 = vld [vmem:[%s2502_s1 + $0x204] ss:$8 sps:$4 sm:$0xff]  }
  0x39   : > { %1039 = vmatpush2.bf16.msra.mxu0 %v1713_v38  ;;  %v237_v38 = vpack.c.bf16 %v229_v35, %v229_v35 }
  0x3a   : > { %1080 = vmatpush2.bf16.msra.mxu1 %v1714_v39  ;;  %1040 = vmatprep.subr.bf16.mxu0 %v1715_v40  ;;  %v231_v39 = vld [vmem:[%s2145_s23 + $0x38] sm:$0xff]  ;;  %v1798_v40 = vld [vmem:[%s2502_s1 + $0x304] ss:$8 sps:$4 sm:$0xff]  }
  0x3b   : > { %1081 = vmatprep.subr.bf16.mxu1 %v1717_v41  ;;  %v239_v41 = vpack.c.bf16 %v231_v39, %v231_v39 }
  0x3d   : > { %1041 = vmatpush2.bf16.msra.mxu0 %v1719_v42  ;;  %v1793_v42 = vld [vmem:[%s2502_s1 + $0x200] ss:$8 sps:$4 sm:$0xff]  }
  0x3e   : > { %1082 = vmatpush2.bf16.msra.mxu1 %v1720_v43  ;;  %1042 = vmatprep.subr.bf16.mxu0 %v1721_v44  ;;  %v1796_v43 = vld [vmem:[%s2502_s1 + $0x300] ss:$8 sps:$4 sm:$0xff]   ;;  %v1801_v44 = vld [vmem:[%s2502_s1 + $0x2f4] ss:$8 sps:$4 sm:$0xff]  }
  0x3f   : > { %1083 = vmatprep.subr.bf16.mxu1 %v1723_v45  ;;  %v1804_v45 = vld [vmem:[%s2502_s1 + $0x3f4] ss:$8 sps:$4 sm:$0xff]  }
  0x41   : > { %1043 = vmatpush2.bf16.msra.mxu0 %v1725_v47  ;;  %v1802_v47 = vld [vmem:[%s2502_s1 + $0x3f0] ss:$8 sps:$4 sm:$0xff]  }
  0x42   : > { %1084 = vmatpush2.bf16.msra.mxu1 %v1726_v48  ;;  %1044 = vmatprep.subr.bf16.mxu0 %v1727_v51  ;;  %v1807_v48 = vld [vmem:[%s2502_s1 + $0x2e4] ss:$8 sps:$4 sm:$0xff]   ;;  %v1808_v51 = vld [vmem:[%s2502_s1 + $0x3e0] ss:$8 sps:$4 sm:$0xff]  }
  0x43   : > { %1085 = vmatprep.subr.bf16.mxu1 %v1729_v53  ;;  %v1816_v53 = vld [vmem:[%s2502_s1 + $0x3d4] ss:$8 sps:$4 sm:$0xff]  }
  0x45   : > { %1045 = vmatpush2.bf16.msra.mxu0 %v1731_v54  ;;  %v1811_v54 = vld [vmem:[%s2502_s1 + $0x2d0] ss:$8 sps:$4 sm:$0xff]  }
  0x46   : > { %1086 = vmatpush2.bf16.msra.mxu1 %v1732_v55  ;;  %1046 = vmatprep.subr.bf16.mxu0 %v1733_v56  ;;  %v1814_v55 = vld [vmem:[%s2502_s1 + $0x3d0] ss:$8 sps:$4 sm:$0xff]   ;;  %v1819_v56 = vld [vmem:[%s2502_s1 + $0x2c4] ss:$8 sps:$4 sm:$0xff]  }
  0x47   : > { %1087 = vmatprep.subr.bf16.mxu1 %v1735_v57  ;;  %v1822_v57 = vld [vmem:[%s2502_s1 + $0x3c4] ss:$8 sps:$4 sm:$0xff]  }
  0x49   : > { %1047 = vmatpush2.bf16.msra.mxu0 %v1737_v58  ;;  %v1817_v58 = vld [vmem:[%s2502_s1 + $0x2c0] ss:$8 sps:$4 sm:$0xff]  }
  0x4a   : > { %1088 = vmatpush2.bf16.msra.mxu1 %v1738_v59  ;;  %1048 = vmatprep.subr.bf16.mxu0 %v1739_v60  ;;  %v1820_v59 = vld [vmem:[%s2502_s1 + $0x3c0] ss:$8 sps:$4 sm:$0xff]   ;;  %v1825_v60 = vld [vmem:[%s2502_s1 + $0x2b4] ss:$8 sps:$4 sm:$0xff]  }
  0x4b   : > { %1089 = vmatprep.subr.bf16.mxu1 %v1741_v61  ;;  %v1828_v61 = vld [vmem:[%s2502_s1 + $0x3b4] ss:$8 sps:$4 sm:$0xff]  }
  0x4d   : > { %1049 = vmatpush2.bf16.msra.mxu0 %v1743_v62  ;;  %v1823_v62 = vld [vmem:[%s2502_s1 + $0x2b0] ss:$8 sps:$4 sm:$0xff]  }
  0x4e   : > { %1090 = vmatpush2.bf16.msra.mxu1 %v1744_v63  ;;  %1050 = vmatprep.subr.bf16.mxu0 %v1745_v0  ;;  %v1826_v63 = vld [vmem:[%s2502_s1 + $0x3b0] ss:$8 sps:$4 sm:$0xff]   ;;  %v1831_v0 = vld [vmem:[%s2502_s1 + $0x2a4] ss:$8 sps:$4 sm:$0xff]  }
  0x4f   : > { %1091 = vmatprep.subr.bf16.mxu1 %v1747_v1  ;;  %v1834_v1 = vld [vmem:[%s2502_s1 + $0x3a4] ss:$8 sps:$4 sm:$0xff]  }
  0x51   : > { %1051 = vmatpush2.bf16.msra.mxu0 %v1749_v2  ;;  %v1829_v2 = vld [vmem:[%s2502_s1 + $0x2a0] ss:$8 sps:$4 sm:$0xff]  }
  0x52   : > { %1092 = vmatpush2.bf16.msra.mxu1 %v1750_v3  ;;  %1102 = vmatprep.subr.bf16.mxu0 %v1753_v6  ;;  %v1832_v3 = vld [vmem:[%s2502_s1 + $0x3a0] ss:$8 sps:$4 sm:$0xff]   ;;  %v1835_v6 = vld [vmem:[%s2502_s1 + $0x290] ss:$8 sps:$4 sm:$0xff]  }
  0x53   : > { %1143 = vmatprep.subr.bf16.mxu1 %v1756_v7  ;;  %v1838_v7 = vld [vmem:[%s2502_s1 + $0x390] ss:$8 sps:$4 sm:$0xff]  }
  0x54   : > { %1053 = vmatmul.mubr.bf16.vlgmr.msra.gmra.mxu0 %v232_v8  ;;  %v1843_v8 = vld [vmem:[%s2502_s1 + $0x284] ss:$8 sps:$4 sm:$0xff]  }
  0x55   : > { %1094 = vmatmul.mubr.bf16.vlgmr.msra.gmra.mxu1 %v234_v9  ;;  %1103 = vmatpush1.bf16.msra.mxu0 %v1751_v10  ;;  %v1846_v9 = vld [vmem:[%s2502_s1 + $0x384] ss:$8 sps:$4 sm:$0xff]   ;;  %v1841_v10 = vld [vmem:[%s2502_s1 + $0x280] ss:$8 sps:$4 sm:$0xff]  }
  0x56   : > { %1144 = vmatpush1.bf16.msra.mxu1 %v1754_v11  ;;  %1104 = vmatprep.subr.bf16.mxu0 %v1759_v12  ;;  %v1844_v11 = vld [vmem:[%s2502_s1 + $0x380] ss:$8 sps:$4 sm:$0xff]  }
  0x57   : > { %1145 = vmatprep.subr.bf16.mxu1 %v1762_v13  ;;  %1134 = vmatprep.mubr.bf16.mxu0 %v237_v38  ;;  %v228_v12 = vld [vmem:[%s2145_s23 + $0x20] sm:$0xff]  ;;  %v230_v13 = vld [vmem:[%s2145_s23 + $0x30] sm:$0xff]  ;;  %s1590_s23 = sshll.u32 %s1981_s22, 7  ;;  %s1929_s22 = smov [#allocation2]  }
  0x58   : > { %1175 = vmatprep.mubr.bf16.mxu1 %v239_v41  ;;  %s2466_s16 = scalar_lea.hbm %s2506_s5, %s1590_s23  ;;  %s1871_s25 = sshll.u32 %s1929_s22, 4  ;;  %s1872_s25 = int_to_ptr.vmem [resolvable:$false] %s1871_s25 }
  0x59   : > { %1105 = vmatpush1.bf16.msra.mxu0 %v1757_v14  ;;  %v236_v14 = vpack.c.bf16 %v228_v12, %v228_v12  ;;  %s1873_s26 = scalar_lea.vmem %s1872_s25, 256  ;;  %p1874_p0 = scmp.lt.s32.totalorder %s1379_s12, %s1872_s25 }
  0x5a   : > { %1146 = vmatpush1.bf16.msra.mxu1 %v1760_v15  ;;  %1106 = vmatprep.subr.bf16.mxu0 %v1765_v16  ;;  %v238_v15 = vpack.c.bf16 %v230_v13, %v230_v13  ;;  %v1847_v16 = vld [vmem:[%s2504_s3 + $0x78] sm:$0xff]   ;;  %p1875_p1 = scmp.lt.s32.totalorder %s1873_s26, %s1867_s15 }
  0x5b   : > { %1147 = vmatprep.subr.bf16.mxu1 %v1768_v17  ;;  %v1848_v17 = vld [vmem:[%s2504_s3 + $0x38] sm:$0xff]  }
  0x5c   : > { %p1876_p2 = por %p1875_p1, %p1874_p0 }
  0x5d   : > { %1107 = vmatpush1.bf16.msra.mxu0 %v1763_v18  ;;  %v1849_v18 = vld [vmem:[%s2504_s3 + $0x70] sm:$0xff]  }
  0x5e   : > { %1148 = vmatpush1.bf16.msra.mxu1 %v1766_v19  ;;  %1108 = vmatprep.subr.bf16.mxu0 %v1771_v20  ;;  %v1850_v19 = vld [vmem:[%s2504_s3 + $0x30] sm:$0xff]   ;;  %v1851_v20 = vld [vmem:[%s2504_s3 + $0x68] sm:$0xff]   ;;  %p1877_p3 = pnand %p1876_p2, %p1870_p13 }
  0x5f   : > { %1149 = vmatprep.subr.bf16.mxu1 %v1774_v21  ;;  %v1852_v21 = vld [vmem:[%s2504_s3 + $0x28] sm:$0xff]  }
  0x61   : > { %1109 = vmatpush1.bf16.msra.mxu0 %v1769_v22  ;;  %v1853_v22 = vld [vmem:[%s2504_s3 + $0x60] sm:$0xff]  }
  0x62   : > { %1150 = vmatpush1.bf16.msra.mxu1 %v1772_v23  ;;  %1110 = vmatprep.subr.bf16.mxu0 %v1777_v24  ;;  %v1854_v23 = vld [vmem:[%s2504_s3 + $0x20] sm:$0xff]   ;;  %v1855_v24 = vld [vmem:[%s2504_s3 + $0x58] sm:$0xff]  }
  0x63   : > { %1151 = vmatprep.subr.bf16.mxu1 %v1780_v25  ;;  %v1856_v25 = vld [vmem:[%s2504_s3 + $0x18] sm:$0xff]  }
  0x65   : > { %1111 = vmatpush1.bf16.msra.mxu0 %v1775_v26  ;;  %v1857_v26 = vld [vmem:[%s2504_s3 + $0x50] sm:$0xff]  }
  0x66   : > { %1152 = vmatpush1.bf16.msra.mxu1 %v1778_v27  ;;  %1112 = vmatprep.subr.bf16.mxu0 %v1783_v28  ;;  %v1858_v27 = vld [vmem:[%s2504_s3 + $0x10] sm:$0xff]   ;;  %v1859_v28 = vld [vmem:[%s2504_s3 + $0x48] sm:$0xff]  }
  0x67   : > { %1153 = vmatprep.subr.bf16.mxu1 %v1786_v29  ;;  %v1860_v29 = vld [vmem:[%s2504_s3 + $0x8] sm:$0xff]  }
  0x69   : > { %1113 = vmatpush1.bf16.msra.mxu0 %v1781_v30  ;;  %v1861_v30 = vld [vmem:[%s2504_s3 + $0x40] sm:$0xff]  }
  0x6a   : > { %1154 = vmatpush1.bf16.msra.mxu1 %v1784_v31  ;;  %1114 = vmatprep.subr.bf16.mxu0 %v1789_v32  ;;  %v1862_v31 = vld [vmem:[%s2504_s3] sm:$0xff]  }
  0x6b   : > { %1155 = vmatprep.subr.bf16.mxu1 %v1792_v33 }
  0x6d   : > { %1115 = vmatpush1.bf16.msra.mxu0 %v1787_v34 }
  0x6e   : > { %1156 = vmatpush1.bf16.msra.mxu1 %v1790_v36  ;;  %1116 = vmatprep.subr.bf16.mxu0 %v1795_v37 }
  0x6f   : > { %1157 = vmatprep.subr.bf16.mxu1 %v1798_v40  ;;  %v370_v40 = vlaneseq }
  0x71   : > { %1117 = vmatpush1.bf16.msra.mxu0 %v1793_v42  ;;  %v371_v41 = vshrl.u32 %v370_v40, 7 }
  0x72   : > { %1158 = vmatpush1.bf16.msra.mxu1 %v1796_v43  ;;  %1118 = vmatprep.subr.bf16.mxu0 %v1801_v44  ;;  %v368_v43 = vld [vmem:[%s2503_s2] sm:$0x3] }
  0x73   : > { %1159 = vmatprep.subr.bf16.mxu1 %v1804_v45  ;;  %v372_v42 = vsub.s32 0, %v371_v41  ;;  %v376_v44 = vsub.s32 1, %v371_v41 }
  0x75   : > { %1119 = vmatpush2.bf16.msra.mxu0 %v1799_v46  ;;  %v373_v45 = vrot.slane %v368_v43, %v372_v42  ;;  %v377_v46 = vrot.slane %v368_v43, %v376_v44 }
  0x76   : > { %1160 = vmatpush2.bf16.msra.mxu1 %v1802_v47  ;;  %1120 = vmatprep.subr.bf16.mxu0 %v1807_v48 }
  0x77   : > { %1161 = vmatprep.subr.bf16.mxu1 %v1810_v49 }
  0x79   : > { %1121 = vmatpush2.bf16.msra.mxu0 %v1805_v50 }
  0x7a   : > { %1162 = vmatpush2.bf16.msra.mxu1 %v1808_v51  ;;  %1122 = vmatprep.subr.bf16.mxu0 %v1813_v52 }
  0x7b   : > { %1163 = vmatprep.subr.bf16.mxu1 %v1816_v53 }
  0x7d   : > { %1123 = vmatpush2.bf16.msra.mxu0 %v1811_v54 }
  0x7e   : > { %1164 = vmatpush2.bf16.msra.mxu1 %v1814_v55  ;;  %1124 = vmatprep.subr.bf16.mxu0 %v1819_v56 }
  0x7f   : > { %1165 = vmatprep.subr.bf16.mxu1 %v1822_v57 }
  0x81   : > { %1125 = vmatpush2.bf16.msra.mxu0 %v1817_v58 }
  0x82   : > { %1166 = vmatpush2.bf16.msra.mxu1 %v1820_v59  ;;  %1126 = vmatprep.subr.bf16.mxu0 %v1825_v60 }
  0x83   : > { %1167 = vmatprep.subr.bf16.mxu1 %v1828_v61 }
  0x85   : > { %1127 = vmatpush2.bf16.msra.mxu0 %v1823_v62 }
  0x86   : > { %1168 = vmatpush2.bf16.msra.mxu1 %v1826_v63  ;;  %1128 = vmatprep.subr.bf16.mxu0 %v1831_v0 }
  0x87   : > { %1169 = vmatprep.subr.bf16.mxu1 %v1834_v1 }
  0x89   : > { %1129 = vmatpush2.bf16.msra.mxu0 %v1829_v2 }
  0x8a   : > { %1170 = vmatpush2.bf16.msra.mxu1 %v1832_v3  ;;  %1130 = vmatprep.subr.bf16.mxu0 %v1837_v4  ;;  %v1572_v4 = vld [vmem:[%s2505_s4] ss:$0 sm:$0xff] }
  0x8b   : > { %1171 = vmatprep.subr.bf16.mxu1 %v1840_v5 }
  0x8d   : > { %1131 = vmatpush2.bf16.msra.mxu0 %v1835_v6 }
  0x8e   : > { %1172 = vmatpush2.bf16.msra.mxu1 %v1838_v7  ;;  %1132 = vmatprep.subr.bf16.mxu0 %v1843_v8 }
  0x8f   : > { %1173 = vmatprep.subr.bf16.mxu1 %v1846_v9 }
  0x91   : > { %1133 = vmatpush2.bf16.msra.mxu0 %v1841_v10 }
  0x92   : > { %1174 = vmatpush2.bf16.msra.mxu1 %v1844_v11  ;;  %1594 = vmatprep.subr.bf16.mxu0 %v1847_v16 }
  0x94   : > { %1135 = vmatmul.mubr.bf16.vlgmr.msra.gmra.mxu0 %v236_v14 }
  0x95   : > { %1176 = vmatmul.mubr.bf16.vlgmr.msra.gmra.mxu1 %v238_v15  ;;  %1595 = vmatpush3.bf16.msra.mxu0 %v1848_v17 }
  0x96   : > { %1596 = vmatprep.subr.bf16.mxu0 %v1849_v18 }
  0x99   : > { %1597 = vmatpush3.bf16.msra.mxu0 %v1850_v19 }
  0x9a   : > { %1598 = vmatprep.subr.bf16.mxu0 %v1851_v20 }
  0x9d   : > { %1599 = vmatpush3.bf16.msra.mxu0 %v1852_v21 }
  0x9e   : > { %1600 = vmatprep.subr.bf16.mxu0 %v1853_v22 }
  0xa1   : > { %1601 = vmatpush3.bf16.msra.mxu0 %v1854_v23 }
  0xa2   : > { %1602 = vmatprep.subr.bf16.mxu0 %v1855_v24 }
  0xa5   : > { %1603 = vmatpush3.bf16.msra.mxu0 %v1856_v25 }
  0xa6   : > { %1604 = vmatprep.subr.bf16.mxu0 %v1857_v26 }
  0xa9   : > { %1605 = vmatpush3.bf16.msra.mxu0 %v1858_v27 }
  0xaa   : > { %1606 = vmatprep.subr.bf16.mxu0 %v1859_v28 }
  0xad   : > { %1607 = vmatpush3.bf16.msra.mxu0 %v1860_v29 }
  0xae   : > { %1608 = vmatprep.subr.bf16.mxu0 %v1861_v30 }
  0xb1   : > { %1609 = vmatpush3.bf16.msra.mxu0 %v1862_v31 }
 0x114   : > { %v1054_v32 = vpop.f32.mrf.mxu0 }
 0x115   : > { %v1095_v33 = vpop.f32.mrf.mxu1  ;;  %v1055_v47 = vadd.f32 %v1054_v32, %v373_v45 }
 0x116   : > { %v1056_v34 = vpop.f32.mrf.mxu0 }
 0x117   : > { %v1097_v35 = vpop.f32.mrf.mxu1  ;;  %v1057_v48 = vadd.f32 %v1056_v34, %v377_v46  ;;  %v1096_v49 = vadd.f32 %v1095_v33, %v1055_v47 }
 0x118   : > { %v1058_v36 = vpop.f32.mrf.mxu0 }
 0x119   : > { %v1099_v37 = vpop.f32.mrf.mxu1  ;;  %v1098_v52 = vadd.f32 %v1097_v35, %v1057_v48 }
 0x11a   : > { %v1059_v38 = vpop.f32.mrf.mxu0 }
 0x11b   : > { %v1100_v39 = vpop.f32.mrf.mxu1 }
 0x154   : > { %v1136_v50 = vpop.f32.mrf.mxu0 }
 0x155   : > { %v1177_v51 = vpop.f32.mrf.mxu1  ;;  %v1137_v53 = vadd.f32 %v1136_v50, %v1096_v49 }
 0x156   : > { %v1138_v54 = vpop.f32.mrf.mxu0 }
 0x157   : > { %v1179_v55 = vpop.f32.mrf.mxu1  ;;  %v1178_v56 = vadd.f32 %v1177_v51, %v1137_v53  ;;  %v1139_v57 = vadd.f32 %v1138_v54, %v1098_v52 }
 0x158   : > { %v1140_v58 = vpop.f32.mrf.mxu0 }
 0x159   : > { %v1181_v59 = vpop.f32.mrf.mxu1  ;;  %v1180_v60 = vadd.f32 %v1179_v55, %v1139_v57  ;;  %1863 = vtanh.f32 %v1178_v56 }
 0x15a   : > { %v1141_v61 = vpop.f32.mrf.mxu0 }
 0x15b   : > { %v1182_v62 = vpop.f32.mrf.mxu1  ;;  %1865 = vtanh.f32 %v1180_v60 }
 0x166   : > { %v1864_v63 = vpop.eup %1863 }
 0x167   : > { %v1186_v2 = vpack.c.bf16 %v1864_v63, %v1864_v63 }
 0x168   : > { %v1866_v0 = vpop.eup %1865 }
 0x169   : > { %v1187_v1 = vpack.c.bf16 %v1866_v0, %v1866_v0 }
 0x16b   : > { %1355 = vmatprep.mubr.bf16.mxu0 %v1187_v1 }
 0x16c   : > { %1356 = vmatmul.mubr.bf16.vlgmr.msra.gmra.mxu0 %v1186_v2 }
 0x22c   : > { %v1610_v3 = vpop.f32.mrf.mxu0 }
 0x22e   : > { %v1611_v5 = vpop.f32.mrf.mxu0 }
 0x22f   : > { %v1612_v6 = vadd.f32 %v1611_v5, %v1610_v3 }
 0x230   : > { %v1613_v7 = vpop.f32.mrf.mxu0 }
 0x231   : > { %v1358_v8 = vadd.f32 %v1612_v6, %v1572_v4 }
 0x232   : > { %v1614_v9 = vpop.f32.mrf.mxu0 }
 0x233   : > { %1363 = vst [vmem:[%s217_s11] sm:$0xff] %v1358_v8 }
 0x234   : > { %1880 = shalt.err (!%p1877_p3)
}
 0x235   : > { %s1881_s30 = scalar_lea.hbm %s2466_s16, 128  ;;  %s1885_s8 = scalar_lea.hbm %s2506_s5, 256 }
 0x236   : > { %p1882_p4 = scmp.ne.s32.totalorder %s2466_s16, %s1881_s30  ;;  %p1886_p9 = scmp.lt.s32.totalorder %s2466_s16, %s2506_s5 }
 0x237   : > { %p1887_p10 = scmp.lt.s32.totalorder %s1885_s8, %s1881_s30 }
 0x238   : > { %p1883_p7 = pnand %p1882_p4, %p1998_p5 }
 0x239   : > { %p1888_p11 = por %p1887_p10, %p1886_p9 }
 0x23a   : > { %p1884_p8 = pneg %p1883_p7 }
 0x23c   : > { %p1889_p12 = pnand %p1888_p11, %p1884_p8 }
 0x23e   : > { %1892 = shalt.err (!%p1889_p12)
}
 0x23f   : > { %1616 = dma.vmem_to_hbm [thread:$0]  (%p1998_p5), %s1379_s12, 128, %s2466_s16, %s1365_s17  }
 0x240 PF: > { %p1622_p13 = scmp.ge.s32.totalorder %s1927_s21, 2  ;;  %s1390_s23 = sand.u32 1, %s1915_s18  }
 0x241   : > { %s1391_s11 = scalar_lea.sflag [#allocation3], %s1390_s23 }
 0x242   : > { %p1619_p0 = pnand %p1622_p13, %p2002_p6 }
 0x244   : > { %p1620_p1 = pneg %p1619_p0 }
 0x246   : > { %1910 = dma.done.wait (%p1620_p1), %s1391_s11, 128  }
 0x247   : > { %1912 = vsyncadd (%p1620_p1), %s1391_s11, 4294967168  ;;  %p15_p2 = scmp.ge.s32.totalorder %s1985_s24, 4   ;;  %s2509_s18 = smov %s1919_s19 }
 0x248   : > { %s2510_s19 = smov %s1923_s20  ;;  %s2511_s20 = smov %s1996_s27 }
 0x249   : > { %s2512_s21 = smov %s1985_s24  ;;  %17 = sbr.rel (!%p15_p2) target bundleno = 3 (0x3), region = 75 }
 0x24e   :  { %1396 = vsyncpa [#allocation3], 1 }
 0x24f   :  { %1398 = vsyncpa [#allocation3 + $0x1], 1 }

</bundles_post_ra>
